<compile_context>
chip_gen: v5e
topology: v5e:2x2
jax: 0.10.0
libtpu: 0.0.40
codegen_flags: <defaults>
</compile_context>

<pallas_src>
import functools

import jax
import jax.numpy as jnp
from jax.experimental import pallas as pl
from jax.experimental.pallas import tpu as pltpu

LANES = 128
ROW_ALIGN = 16   # sublane alignment safe for both f32 (8) and bf16 (16) tiles
TILE_CAP = 512   # max batch-tile rows: multiple of 256 (v6e/v7x MXU M) and of 128 (v5e)


def _round_up(n, m):
    return ((n + m - 1) // m) * m


def _pad_to(x, shape):
    return jnp.pad(x, [(0, s - d) for d, s in zip(x.shape, shape)])


def _mlp_kernel(x_ref, w1_ref, w2_ref, w3_ref, b_ref, o_ref, *, h1p, h2p, nop):
    # Layer 1: bf16 MXU operands, f32 accumulation; bias add + ReLU in f32.
    h = jnp.dot(x_ref[...], w1_ref[...], preferred_element_type=jnp.float32)
    h = jnp.maximum(h + b_ref[0:1, :h1p], 0.0).astype(jnp.bfloat16)
    # Layer 2
    h = jnp.dot(h, w2_ref[...], preferred_element_type=jnp.float32)
    h = jnp.maximum(h + b_ref[1:2, :h2p], 0.0).astype(jnp.bfloat16)
    # Output layer (Identity output activation, as in spinup core.mlp)
    out = jnp.dot(h, w3_ref[...], preferred_element_type=jnp.float32)
    o_ref[...] = (out + b_ref[2:3, :nop]).astype(o_ref.dtype)


def classifier_forward(obs, act, params, use_act=True, out_dtype=jnp.float32):
    """Classifier MLP forward pass with a single Pallas kernel.

    obs: [B, obs_dim]; act: [B, act_dim] or None (use_act=False).
    params: (w1, b1, w2, b2, w3, b3); w_i are [in, out], b_i are [1, out], float32.
    Returns [B, n_outputs] float32.
    """
    w1, b1, w2, b2, w3, b3 = params
    B = obs.shape[0]
    h1, h2, n_out = w1.shape[1], w2.shape[1], w3.shape[1]

    # Pack obs/act into a single input (fused with the pad/cast below by XLA).
    if use_act:
        assert act is not None
        x = jnp.concatenate([obs, act], axis=-1)
    else:
        assert act is None
        x = obs
    in_dim = x.shape[1]
    assert w1.shape[0] == in_dim

    # Lane-dense padded feature widths.
    in_pdim, h1p, h2p, nop = (_round_up(d, LANES) for d in (in_dim, h1, h2, n_out))

    # Balanced batch tiling: big tiles for overhead amortization, >= 2 grid steps when there
    # are enough real rows (v7x dual-TC sharding of the "parallel" axis), < 16 pad rows/tile.
    n_tiles = pl.cdiv(B, TILE_CAP)
    if n_tiles < 2 and B >= 2 * ROW_ALIGN:
        n_tiles = 2
    tm = _round_up(pl.cdiv(B, n_tiles), ROW_ALIGN)
    Bp = n_tiles * tm

    x_pad = _pad_to(x, (Bp, in_pdim)).astype(jnp.bfloat16)
    w1_pad = _pad_to(w1, (in_pdim, h1p)).astype(jnp.bfloat16)
    w2_pad = _pad_to(w2, (h1p, h2p)).astype(jnp.bfloat16)
    w3_pad = _pad_to(w3, (h2p, nop)).astype(jnp.bfloat16)

    # Pack the three biases into one lane-aligned f32 buffer (single small DMA).
    bw = max(h1p, h2p, nop)
    b_packed = jnp.zeros((8, bw), jnp.float32)
    b_packed = b_packed.at[0, :h1].set(b1[0])
    b_packed = b_packed.at[1, :h2].set(b2[0])
    b_packed = b_packed.at[2, :n_out].set(b3[0])

    # VMEM budget estimate (double-buffered tiles + resident weights + in-kernel temporaries).
    out_bytes = jnp.dtype(out_dtype).itemsize
    weight_bytes = 2 * (in_pdim * h1p + h1p * h2p + h2p * nop)        # bf16 weights
    act_bytes = tm * (in_pdim * 2 + nop * out_bytes) + tm * (h1p + h2p) * 4
    vmem_need = 2 * (weight_bytes + 8 * bw * 4) + 2 * act_bytes
    cparam_kwargs = dict(dimension_semantics=("parallel",))
    if vmem_need > 12 * 1024 * 1024:  # approaching v5e's 16 MiB scoped default
        cparam_kwargs["vmem_limit_bytes"] = min(int(vmem_need * 1.25), 48 * 1024 * 1024)

    # Weights/bias stay resident across the batch grid (constant index_map).
    # TODO(synk): single-buffer the resident weights (pipeline_mode=pl.Buffered(1)) once large
    # hidden sizes make doubled weight VMEM matter on v7x; kept default-buffered here.
    res_spec = lambda shp: pl.BlockSpec(shp, lambda i: (0, 0))

    out_pad = pl.pallas_call(
        functools.partial(_mlp_kernel, h1p=h1p, h2p=h2p, nop=nop),
        out_shape=jax.ShapeDtypeStruct((Bp, nop), out_dtype),
        grid=(n_tiles,),
        in_specs=[
            pl.BlockSpec((tm, in_pdim), lambda i: (i, 0)),   # batch-tiled packed input
            res_spec(w1_pad.shape),
            res_spec(w2_pad.shape),
            res_spec(w3_pad.shape),
            res_spec(b_packed.shape),
        ],
        out_specs=pl.BlockSpec((tm, nop), lambda i: (i, 0)),  # lane-dense output store
        compiler_params=pltpu.CompilerParams(**cparam_kwargs),
    )(x_pad, w1_pad, w2_pad, w3_pad, b_packed)

    # Slice padded output back to the logical shape; always return f32 logits (cheap, XLA-side).
    return out_pad[:B, :n_out].astype(jnp.float32)


def init_linear(key, fan_in, fan_out):
    """Mirrors torch.nn.Linear default init (uniform +-1/sqrt(fan_in))."""
    kw, kb = jax.random.split(key)
    bound = 1.0 / jnp.sqrt(jnp.float32(fan_in))
    w = jax.random.uniform(kw, (fan_in, fan_out), jnp.float32, -bound, bound)
    b = jax.random.uniform(kb, (1, fan_out), jnp.float32, -bound, bound)
    return w, b


def reference_forward_bf16(obs, act, params, use_act=True):
    """Reference mirroring the kernel's bf16-operand / f32-accumulate matmuls."""
    x = jnp.concatenate([obs, act], axis=-1) if use_act else obs
    w1, b1, w2, b2, w3, b3 = params

    def lin(h, w, b):
        return jnp.dot(h.astype(jnp.bfloat16), w.astype(jnp.bfloat16),
                       preferred_element_type=jnp.float32) + b

    h = jnp.maximum(lin(x, w1, b1), 0.0)
    h = jnp.maximum(lin(h, w2, b2), 0.0)
    return lin(h, w3, b3)


def reference_forward_f32(obs, act, params, use_act=True):
    x = jnp.concatenate([obs, act], axis=-1) if use_act else obs
    w1, b1, w2, b2, w3, b3 = params
    h = jnp.maximum(x @ w1 + b1, 0.0)
    h = jnp.maximum(h @ w2 + b2, 0.0)
    return h @ w3 + b3


if __name__ == "__main__":
    obs_dim, act_dim = 16, 8
    hidden_sizes = (32, 32)
    n_outputs = 4
    batch = 8

    key = jax.random.PRNGKey(0)
    k_obs, k_act, k_obs_b, k_act_b, k1, k2, k3, k1b = jax.random.split(key, 8)

    obs = jax.random.normal(k_obs, (batch, obs_dim), jnp.float32)
    act = jax.random.normal(k_act, (batch, act_dim), jnp.float32)

    fwd = jax.jit(classifier_forward, static_argnames=("use_act", "out_dtype"))

    # --- use_act=True, small batch (single grid step) ---
    w1, b1 = init_linear(k1, obs_dim + act_dim, hidden_sizes[0])
    w2, b2 = init_linear(k2, hidden_sizes[0], hidden_sizes[1])
    w3, b3 = init_linear(k3, hidden_sizes[1], n_outputs)
    params = (w1, b1, w2, b2, w3, b3)

    out = jax.block_until_ready(fwd(obs, act, params, use_act=True))
    ref_bf16 = reference_forward_bf16(obs, act, params, use_act=True)
    ref_f32 = reference_forward_f32(obs, act, params, use_act=True)
    assert out.shape == (batch, n_outputs)
    assert jnp.allclose(out, ref_bf16, atol=2e-3, rtol=2e-3)
    assert jnp.allclose(out, ref_f32, atol=5e-2, rtol=5e-2)

    # --- use_act=True, larger batch (balanced multi-tile grid / dual-TC path) ---
    big = 300
    obs_big = jax.random.normal(k_obs_b, (big, obs_dim), jnp.float32)
    act_big = jax.random.normal(k_act_b, (big, act_dim), jnp.float32)
    out_big = jax.block_until_ready(fwd(obs_big, act_big, params, use_act=True))
    ref_big = reference_forward_bf16(obs_big, act_big, params, use_act=True)
    assert out_big.shape == (big, n_outputs)
    assert jnp.allclose(out_big, ref_big, atol=2e-3, rtol=2e-3)

    # --- optional bf16 output store (v5e HBM-bound path) ---
    out_bf = jax.block_until_ready(fwd(obs, act, params, use_act=True, out_dtype=jnp.bfloat16))
    assert out_bf.shape == (batch, n_outputs) and out_bf.dtype == jnp.float32
    assert jnp.allclose(out_bf, ref_f32, atol=5e-2, rtol=5e-2)

    # --- use_act=False ---
    w1n, b1n = init_linear(k1b, obs_dim, hidden_sizes[0])
    params_no_act = (w1n, b1n, w2, b2, w3, b3)
    out2 = jax.block_until_ready(fwd(obs, None, params_no_act, use_act=False))
    ref2 = reference_forward_bf16(obs, None, params_no_act, use_act=False)
    assert out2.shape == (batch, n_outputs)
    assert jnp.allclose(out2, ref2, atol=2e-3, rtol=2e-3)

    print("KERNEL_OK")
</pallas_src>

<mosaic_0001>
module attributes {stable_mosaic.version = 11 : i64} {
  func.func @_mlp_kernel(%arg0: i32, %arg1: memref<16x128xbf16, #tpu.memory_space<vmem>>, %arg2: memref<128x128xbf16, #tpu.memory_space<vmem>>, %arg3: memref<128x128xbf16, #tpu.memory_space<vmem>>, %arg4: memref<128x128xbf16, #tpu.memory_space<vmem>>, %arg5: memref<8x128xf32, #tpu.memory_space<vmem>>, %arg6: memref<16x128xf32, #tpu.memory_space<vmem>>) attributes {dimension_semantics = [#tpu.dimension_semantics<parallel>], iteration_bounds = array<i64: 1>, scalar_prefetch = 0 : i64, scratch_operands = 0 : i64, tpu.core_type = #tpu.core_type<tc>, window_params = [{transform_indices = @transform_0, window_bounds = array<i64: 16, 128>}, {pipeline_mode = #tpu.pipeline_mode<synchronous>, transform_indices = @transform_1, window_bounds = array<i64: 128, 128>}, {pipeline_mode = #tpu.pipeline_mode<synchronous>, transform_indices = @transform_2, window_bounds = array<i64: 128, 128>}, {pipeline_mode = #tpu.pipeline_mode<synchronous>, transform_indices = @transform_3, window_bounds = array<i64: 128, 128>}, {pipeline_mode = #tpu.pipeline_mode<synchronous>, transform_indices = @transform_4, window_bounds = array<i64: 8, 128>}, {transform_indices = @transform_5, window_bounds = array<i64: 16, 128>}]} {
    %c0 = arith.constant 0 : index
    %c0_0 = arith.constant 0 : index
    %0 = vector.load %arg1[%c0, %c0_0] : memref<16x128xbf16, #tpu.memory_space<vmem>>, vector<16x128xbf16>
    %c0_1 = arith.constant 0 : index
    %c0_2 = arith.constant 0 : index
    %1 = vector.load %arg2[%c0_1, %c0_2] : memref<128x128xbf16, #tpu.memory_space<vmem>>, vector<128x128xbf16>
    %cst = arith.constant dense<0.000000e+00> : vector<16x128xf32>
    %2 = tpu.matmul %0, %1, %cst {dimension_numbers = #tpu.dot_dimension_numbers<[1], [0], [0], [1], [0, 0, 1, 1], [], []>} : vector<16x128xbf16>, vector<128x128xbf16>, vector<16x128xf32> -> vector<16x128xf32>
    %c0_3 = arith.constant 0 : index
    %c0_4 = arith.constant 0 : index
    %3 = vector.load %arg5[%c0_3, %c0_4] : memref<8x128xf32, #tpu.memory_space<vmem>>, vector<1x128xf32>
    %4 = vector.broadcast %3 : vector<1x128xf32> to vector<16x128xf32>
    %5 = arith.addf %2, %4 : vector<16x128xf32>
    %cst_5 = arith.constant 0.000000e+00 : f32
    %6 = vector.broadcast %cst_5 : f32 to vector<16x128xf32>
    %7 = arith.maximumf %5, %6 : vector<16x128xf32>
    %8 = arith.truncf %7 : vector<16x128xf32> to vector<16x128xbf16>
    %c0_6 = arith.constant 0 : index
    %c0_7 = arith.constant 0 : index
    %9 = vector.load %arg3[%c0_6, %c0_7] : memref<128x128xbf16, #tpu.memory_space<vmem>>, vector<128x128xbf16>
    %cst_8 = arith.constant dense<0.000000e+00> : vector<16x128xf32>
    %10 = tpu.matmul %8, %9, %cst_8 {dimension_numbers = #tpu.dot_dimension_numbers<[1], [0], [0], [1], [0, 0, 1, 1], [], []>} : vector<16x128xbf16>, vector<128x128xbf16>, vector<16x128xf32> -> vector<16x128xf32>
    %c1 = arith.constant 1 : index
    %c0_9 = arith.constant 0 : index
    %11 = vector.load %arg5[%c1, %c0_9] : memref<8x128xf32, #tpu.memory_space<vmem>>, vector<1x128xf32>
    %12 = vector.broadcast %11 : vector<1x128xf32> to vector<16x128xf32>
    %13 = arith.addf %10, %12 : vector<16x128xf32>
    %cst_10 = arith.constant 0.000000e+00 : f32
    %14 = vector.broadcast %cst_10 : f32 to vector<16x128xf32>
    %15 = arith.maximumf %13, %14 : vector<16x128xf32>
    %16 = arith.truncf %15 : vector<16x128xf32> to vector<16x128xbf16>
    %c0_11 = arith.constant 0 : index
    %c0_12 = arith.constant 0 : index
    %17 = vector.load %arg4[%c0_11, %c0_12] : memref<128x128xbf16, #tpu.memory_space<vmem>>, vector<128x128xbf16>
    %cst_13 = arith.constant dense<0.000000e+00> : vector<16x128xf32>
    %18 = tpu.matmul %16, %17, %cst_13 {dimension_numbers = #tpu.dot_dimension_numbers<[1], [0], [0], [1], [0, 0, 1, 1], [], []>} : vector<16x128xbf16>, vector<128x128xbf16>, vector<16x128xf32> -> vector<16x128xf32>
    %c2 = arith.constant 2 : index
    %c0_14 = arith.constant 0 : index
    %19 = vector.load %arg5[%c2, %c0_14] : memref<8x128xf32, #tpu.memory_space<vmem>>, vector<1x128xf32>
    %20 = vector.broadcast %19 : vector<1x128xf32> to vector<16x128xf32>
    %21 = arith.addf %18, %20 : vector<16x128xf32>
    %c0_15 = arith.constant 0 : index
    %c0_16 = arith.constant 0 : index
    %22 = vector.load %arg6[%c0_15, %c0_16] : memref<16x128xf32, #tpu.memory_space<vmem>>, vector<16x128xf32>
    tpu.vector_store %arg6[%c0_15, %c0_16], %21 {strides = array<i32>} : memref<16x128xf32, #tpu.memory_space<vmem>>, vector<16x128xf32>,
    return
  }
  func.func @transform_0(%arg0: i32) -> (i32, i32) {
    %c0_i32 = arith.constant 0 : i32
    %c0_i32_0 = arith.constant 0 : i32
    return %arg0, %c0_i32 : i32, i32
  }
  func.func @transform_1(%arg0: i32) -> (i32, i32) {
    %c0_i32 = arith.constant 0 : i32
    %c0_i32_0 = arith.constant 0 : i32
    %c0_i32_1 = arith.constant 0 : i32
    return %c0_i32, %c0_i32_0 : i32, i32
  }
  func.func @transform_2(%arg0: i32) -> (i32, i32) {
    %c0_i32 = arith.constant 0 : i32
    %c0_i32_0 = arith.constant 0 : i32
    %c0_i32_1 = arith.constant 0 : i32
    return %c0_i32, %c0_i32_0 : i32, i32
  }
  func.func @transform_3(%arg0: i32) -> (i32, i32) {
    %c0_i32 = arith.constant 0 : i32
    %c0_i32_0 = arith.constant 0 : i32
    %c0_i32_1 = arith.constant 0 : i32
    return %c0_i32, %c0_i32_0 : i32, i32
  }
  func.func @transform_4(%arg0: i32) -> (i32, i32) {
    %c0_i32 = arith.constant 0 : i32
    %c0_i32_0 = arith.constant 0 : i32
    %c0_i32_1 = arith.constant 0 : i32
    return %c0_i32, %c0_i32_0 : i32, i32
  }
  func.func @transform_5(%arg0: i32) -> (i32, i32) {
    %c0_i32 = arith.constant 0 : i32
    %c0_i32_0 = arith.constant 0 : i32
    return %arg0, %c0_i32 : i32, i32
  }
}

</mosaic_0001>

<bundles_post_ra>
// kernel: classifier_forward.1
= control target key start
LH: loop header
LB: loop body
LE: loop exit
PB: predicated region body
PF: predicated region fallthrough
CT: control target
= control target key end

     0   :  { %s528_s1 = inlined_call_operand.vmem [shape: bf16[128,128], index: 1, kind: input, shape index: {}]   ;;  %s529_s2 = inlined_call_operand.vmem [shape: bf16[128,128], index: 2, kind: input, shape index: {}]   ;;  %s530_s4 = inlined_call_operand.vmem [shape: f32[8,128], index: 4, kind: input, shape index: {}]   ;;  %s531_s0 = inlined_call_operand.vmem [shape: bf16[16,128], index: 0, kind: input, shape index: {}]   ;;  %s532_s3 = inlined_call_operand.vmem [shape: bf16[128,128], index: 3, kind: input, shape index: {}]   ;;  %s533_s5 = inlined_call_operand.vmem [shape: f32[16,128], index: 5, kind: output, shape index: {}]  }
   0x1   :  { %v388_v0 = vld [vmem:[%s528_s1 + $0x38] sm:$0xff]  ;;  %v387_v1 = vld [vmem:[%s528_s1 + $0x30] sm:$0xff]  ;;  %v386_v4 = vld [vmem:[%s528_s1 + $0x28] sm:$0xff] }
   0x2   :  { %94 = vmatpush.bf16.msra.mxu0 %v388_v0  ;;  %v396_v2 = vld [vmem:[%s529_s2 + $0x38] sm:$0xff]  ;;  %v395_v3 = vld [vmem:[%s529_s2 + $0x30] sm:$0xff]  ;;  %v394_v5 = vld [vmem:[%s529_s2 + $0x28] sm:$0xff] }
   0x3   :  { %177 = vmatpush.bf16.msra.mxu1 %v396_v2  ;;  %v385_v6 = vld [vmem:[%s528_s1 + $0x20] sm:$0xff]  ;;  %v384_v8 = vld [vmem:[%s528_s1 + $0x18] sm:$0xff]  ;;  %v383_v9 = vld [vmem:[%s528_s1 + $0x10] sm:$0xff] }
   0x4   :  { %v393_v7 = vld [vmem:[%s529_s2 + $0x20] sm:$0xff]  ;;  %v382_v10 = vld [vmem:[%s528_s1 + $0x8] sm:$0xff]  ;;  %v392_v13 = vld [vmem:[%s529_s2 + $0x18] sm:$0xff] }
   0x5   :  { %v381_v11 = vld [vmem:[%s528_s1] sm:$0xff]  ;;  %v391_v14 = vld [vmem:[%s529_s2 + $0x10] sm:$0xff]  ;;  %v390_v15 = vld [vmem:[%s529_s2 + $0x8] sm:$0xff] }
   0x6   :  { %95 = vmatpush.bf16.msra.mxu0 %v387_v1  ;;  %v380_v12 = vld [vmem:[%s531_s0] sm:$0xff]  ;;  %v404_v17 = vld [vmem:[%s532_s3 + $0x38] sm:$0xff]  ;;  %v403_v18 = vld [vmem:[%s532_s3 + $0x30] sm:$0xff] }
   0x7   :  { %178 = vmatpush.bf16.msra.mxu1 %v395_v3  ;;  %v389_v16 = vld [vmem:[%s529_s2] sm:$0xff]  ;;  %260 = vmatpush.bf16.msra.mxu2 %v404_v17  ;;  %v402_v19 = vld [vmem:[%s532_s3 + $0x28] sm:$0xff]  ;;  %v400_v29 = vld [vmem:[%s532_s3 + $0x18] sm:$0xff] }
   0x8   :  { %v401_v20 = vld [vmem:[%s532_s3 + $0x20] sm:$0xff]  ;;  %v399_v30 = vld [vmem:[%s532_s3 + $0x10] sm:$0xff]  ;;  %v398_v31 = vld [vmem:[%s532_s3 + $0x8] sm:$0xff] }
   0x9   :  { %v405_v22 = vld [vmem:[%s530_s4] ss:$0 sm:$0xff]  ;;  %v406_v34 = vld [vmem:[%s530_s4 + $0x1] ss:$0 sm:$0xff]  ;;  %v407_v41 = vld [vmem:[%s530_s4 + $0x2] ss:$0 sm:$0xff] }
   0xa   :  { %96 = vmatpush.bf16.msra.mxu0 %v386_v4  ;;  %v397_v32 = vld [vmem:[%s532_s3] sm:$0xff] }
   0xb   :  { %179 = vmatpush.bf16.msra.mxu1 %v394_v5  ;;  %261 = vmatpush.bf16.msra.mxu2 %v403_v18 }
   0xe   :  { %97 = vmatpush.bf16.msra.mxu0 %v385_v6 }
   0xf   :  { %180 = vmatpush.bf16.msra.mxu1 %v393_v7  ;;  %262 = vmatpush.bf16.msra.mxu2 %v402_v19 }
  0x12   :  { %98 = vmatpush.bf16.msra.mxu0 %v384_v8 }
  0x13   :  { %181 = vmatpush.bf16.msra.mxu1 %v392_v13  ;;  %263 = vmatpush.bf16.msra.mxu2 %v401_v20 }
  0x16   :  { %99 = vmatpush.bf16.msra.mxu0 %v383_v9 }
  0x17   :  { %182 = vmatpush.bf16.msra.mxu1 %v391_v14  ;;  %264 = vmatpush.bf16.msra.mxu2 %v400_v29 }
  0x1a   :  { %100 = vmatpush.bf16.msra.mxu0 %v382_v10 }
  0x1b   :  { %183 = vmatpush.bf16.msra.mxu1 %v390_v15  ;;  %265 = vmatpush.bf16.msra.mxu2 %v399_v30 }
  0x1e   :  { %101 = vmatpush.bf16.msra.mxu0 %v381_v11 }
  0x1f   :  { %184 = vmatpush.bf16.msra.mxu1 %v389_v16  ;;  %266 = vmatpush.bf16.msra.mxu2 %v398_v31 }
  0x21   :  { %102 = vmatmul.bf16.vlgmr.msra.gmra.mxu0 %v380_v12 }
  0x23   :  { %267 = vmatpush.bf16.msra.mxu2 %v397_v32 }
  0x9e   :  { %v103_v21 = vpop.f32.mrf.mxu0 }
  0x9f   :  { %v104_v23 = vadd.f32 %v405_v22, %v103_v21 }
  0xa1   :  { %v108_v26 = vmax.f32 %v104_v23, 0.0 }
  0xa6   :  { %v105_v24 = vpop.f32.mrf.mxu0 }
  0xa7   :  { %v106_v25 = vadd.f32 %v405_v22, %v105_v24 }
  0xa9   :  { %v109_v27 = vmax.f32 %v106_v25, 0.0 }
  0xab   :  { %v110_v28 = vpack.c.bf16 %v109_v27, %v108_v26 }
  0xad   :  { %185 = vmatmul.bf16.vlgmr.msra.gmra.mxu1 %v110_v28 }
 0x12a   :  { %v186_v33 = vpop.f32.mrf.mxu1 }
 0x12b   :  { %v187_v35 = vadd.f32 %v406_v34, %v186_v33 }
 0x12d   :  { %v191_v38 = vmax.f32 %v187_v35, 0.0 }
 0x132   :  { %v188_v36 = vpop.f32.mrf.mxu1 }
 0x133   :  { %v189_v37 = vadd.f32 %v406_v34, %v188_v36 }
 0x135   :  { %v192_v39 = vmax.f32 %v189_v37, 0.0 }
 0x137   :  { %v193_v40 = vpack.c.bf16 %v192_v39, %v191_v38 }
 0x139   :  { %268 = vmatmul.bf16.vlgmr.msra.gmra.mxu2 %v193_v40 }
 0x1bc   :  { %v269_v42 = vpop.f32.mrf.mxu2 }
 0x1bd   :  { %v270_v43 = vadd.f32 %v407_v41, %v269_v42 }
 0x1bf   :  { %274 = vst [vmem:[%s533_s5] sm:$0xff] %v270_v43 }
 0x1c4   :  { %v271_v44 = vpop.f32.mrf.mxu2 }
 0x1c5   :  { %v272_v45 = vadd.f32 %v407_v41, %v271_v44 }
 0x1c7   :  { %275 = vst [vmem:[%s533_s5 + $0x8] sm:$0xff] %v272_v45 }

</bundles_post_ra>
